<compile_context>
chip_gen: v5e
topology: v5e:2x2
jax: 0.10.0
libtpu: 0.0.40
codegen_flags: <defaults>
</compile_context>

<pallas_src>
import jax
import jax.numpy as jnp
from jax.experimental import pallas as pl
from jax.experimental.pallas import tpu as pltpu

# The reference adds `torch.tensor(10 ^ -18)`; in Python `^` is bitwise XOR, so the
# constant is -28.0 (NOT 1e-18).  Reproduced verbatim to keep exact forward semantics.
_RULE_OFFSET = float(10 ^ -18)  # == -28.0


def _bp_fnn_ce_kernel(x_ref, mu_ref, inv2s2_ref, w3a_ref, w3b_ref, ba_ref, bb_ref,
                      out_ref):
    x = x_ref[...]          # (F, Tn)   batch on lanes
    mu = mu_ref[...]        # (R, F)
    a = inv2s2_ref[...]     # (R, F)    = 1 / (2 * sigma^2)

    n_fea = x.shape[0]
    n_rules = mu.shape[0]
    tile_n = x.shape[1]

    # Gaussian membership exponent summed over features (exp-of-sum rewrite).
    # Unrolled over F so everything stays 2-D (R, Tn): no (R, F, Tn) intermediate.
    s = jnp.zeros((n_rules, tile_n), dtype=jnp.float32)
    for f in range(n_fea):
        d = x[f:f + 1, :] - mu[:, f:f + 1]          # (1,Tn)-(R,1) -> (R, Tn)
        s = s + a[:, f:f + 1] * (d * d)

    # Rule firing strength (+ the reference's XOR "epsilon").
    rule = jnp.exp(-s) + _RULE_OFFSET                # (R, Tn)

    # Normalisation denominator (exact reciprocal, matching torch.reciprocal).
    inv_frn = 1.0 / jnp.sum(rule, axis=0, keepdims=True)   # (1, Tn)

    # TSK consequents on the MXU: (R, F) @ (F, Tn) -> (R, Tn), f32 accumulation.
    conq_a = jnp.dot(w3a_ref[...], x, preferred_element_type=jnp.float32,
                     precision=jax.lax.Precision.HIGHEST) + ba_ref[...]
    conq_b = jnp.dot(w3b_ref[...], x, preferred_element_type=jnp.float32,
                     precision=jax.lax.Precision.HIGHEST) + bb_ref[...]

    # Defuzzified outputs: sum_r norm*conq == (sum_r rule*conq) * inv_frn.
    tsk_a = jnp.sum(rule * conq_a, axis=0, keepdims=True) * inv_frn   # (1, Tn)
    tsk_b = jnp.sum(rule * conq_b, axis=0, keepdims=True) * inv_frn   # (1, Tn)
    out_ref[...] = jnp.concatenate([tsk_a, tsk_b], axis=0)            # (2, Tn)


def bp_fnn_ce_forward(data, para_mu, para_sigma, para_w3, *, tile_n=512):
    """Forward pass of BP_FNN_CE.  data: (N, F) -> (N, 2)."""
    n_batch, n_fea = data.shape
    n_rules = para_mu.shape[0]
    assert para_mu.shape == (n_rules, n_fea)
    assert para_sigma.shape == (n_rules, n_fea)
    assert para_w3.shape == (2, n_rules, n_fea + 1)
    assert tile_n % 128 == 0, "tile_n must be a multiple of 128 (lane width)"

    f32 = jnp.float32
    # Batch on the lane (last) axis: (F, N); pad N up to a multiple of tile_n.
    x_t = jnp.transpose(data.astype(f32))
    n_pad = int(pl.cdiv(n_batch, tile_n)) * tile_n
    if n_pad != n_batch:
        x_t = jnp.pad(x_t, ((0, 0), (0, n_pad - n_batch)))

    # Batch-independent parameter preprocessing, done once outside the kernel.
    mu = para_mu.astype(f32)
    inv_2s2 = 0.5 / jnp.square(para_sigma.astype(f32))       # 1 / (2 sigma^2)
    w3 = para_w3.astype(f32)
    w3a = w3[0, :, :n_fea]                                    # (R, F)
    w3b = w3[1, :, :n_fea]                                    # (R, F)
    ba = w3[0, :, n_fea:n_fea + 1]                            # (R, 1)
    bb = w3[1, :, n_fea:n_fea + 1]                            # (R, 1)

    grid = (n_pad // tile_n,)
    resident = lambda i: (0, 0)   # same block every step -> stays resident in VMEM

    flops = n_pad * (4 * n_rules * n_fea          # fuzzify exponent accumulation
                     + 2 * 2 * n_rules * n_fea    # two consequent matmuls
                     + 8 * n_rules + 8)           # offset, reductions, scaling
    bytes_accessed = 4 * (n_fea * n_pad + 2 * n_pad
                          + 4 * n_rules * n_fea + 2 * n_rules)

    out = pl.pallas_call(
        _bp_fnn_ce_kernel,
        grid=grid,
        in_specs=[
            pl.BlockSpec((n_fea, tile_n), lambda i: (0, i)),   # x^T, tiled over batch
            pl.BlockSpec((n_rules, n_fea), resident),          # mu
            pl.BlockSpec((n_rules, n_fea), resident),          # 1/(2 sigma^2)
            pl.BlockSpec((n_rules, n_fea), resident),          # w3[0, :, :F]
            pl.BlockSpec((n_rules, n_fea), resident),          # w3[1, :, :F]
            pl.BlockSpec((n_rules, 1), resident),              # w3[0, :, F]
            pl.BlockSpec((n_rules, 1), resident),              # w3[1, :, F]
        ],
        out_specs=pl.BlockSpec((2, tile_n), lambda i: (0, i)),
        out_shape=jax.ShapeDtypeStruct((2, n_pad), f32),
        compiler_params=pltpu.CompilerParams(
            dimension_semantics=("parallel",),          # batch tiles across cores
            vmem_limit_bytes=32 * 1024 * 1024),          # safe on v5e/v6e/v7x
        cost_estimate=pl.CostEstimate(
            flops=int(flops),
            transcendentals=int(n_pad * n_rules),
            bytes_accessed=int(bytes_accessed)),
    )(x_t, mu, inv_2s2, w3a, w3b, ba, bb)

    # Back to the PyTorch layout (N, 2); drop batch padding.
    return out[:, :n_batch].T


def _reference_forward(data, para_mu, para_sigma, para_w3):
    """Pure-JAX transcription of BP_FNN_CE.forward (verification only)."""
    x = data.astype(jnp.float32)
    mu = para_mu.astype(jnp.float32)
    sigma = para_sigma.astype(jnp.float32)
    w3 = para_w3.astype(jnp.float32)
    fuzz = jnp.exp(-((x[:, None, :] - mu[None]) ** 2) / (2.0 * sigma[None] ** 2))
    rule = jnp.prod(fuzz, axis=2) + _RULE_OFFSET
    inv_frn = 1.0 / jnp.sum(rule, axis=1, keepdims=True)
    norm = rule * inv_frn
    conq_a = w3[0, :, -1][None, :] + jnp.sum(w3[0, :, :-1][None] * x[:, None, :], axis=2)
    conq_b = w3[1, :, -1][None, :] + jnp.sum(w3[1, :, :-1][None] * x[:, None, :], axis=2)
    tsk_a = jnp.sum(norm * conq_a, axis=1)
    tsk_b = jnp.sum(norm * conq_b, axis=1)
    # TODO(synk): the reference's `torch.isnan(...)` diagnostic print is a pure
    # side-effect (the returned tensor is unchanged) and is not reproduced.
    return jnp.stack([tsk_a, tsk_b], axis=1)


if __name__ == "__main__":
    n_rules, n_fea, n_batch = 8, 8, 1000   # N not a tile multiple -> exercises padding

    key = jax.random.PRNGKey(0)
    k_mu, k_sigma, k_w3, k_x = jax.random.split(key, 4)

    # Parameters drawn like the PyTorch __init__ (torch.rand -> U[0,1)); sigma kept
    # away from 0 so 1/(2 sigma^2) stays numerically sane in the demo.
    para_mu = jax.random.uniform(k_mu, (n_rules, n_fea), jnp.float32)
    para_sigma = jax.random.uniform(k_sigma, (n_rules, n_fea), jnp.float32,
                                    minval=0.05, maxval=1.0)
    para_w3 = jax.random.uniform(k_w3, (2, n_rules, n_fea + 1), jnp.float32)
    data = jax.random.uniform(k_x, (n_batch, n_fea), jnp.float32)

    out = bp_fnn_ce_forward(data, para_mu, para_sigma, para_w3, tile_n=256)
    out = jax.block_until_ready(out)

    assert out.shape == (n_batch, 2)
    assert bool(jnp.all(jnp.isfinite(out)))

    ref = _reference_forward(data, para_mu, para_sigma, para_w3)
    max_err = float(jnp.max(jnp.abs(out - ref)))
    assert max_err < 2e-3, f"mismatch vs reference: max abs err = {max_err}"

    print("KERNEL_OK")
</pallas_src>

<mosaic_0001>
module attributes {stable_mosaic.version = 11 : i64} {
  func.func @_bp_fnn_ce_kernel(%arg0: i32, %arg1: memref<8x256xf32, #tpu.memory_space<vmem>>, %arg2: memref<8x8xf32, #tpu.memory_space<vmem>>, %arg3: memref<8x8xf32, #tpu.memory_space<vmem>>, %arg4: memref<8x8xf32, #tpu.memory_space<vmem>>, %arg5: memref<8x8xf32, #tpu.memory_space<vmem>>, %arg6: memref<8x1xf32, #tpu.memory_space<vmem>>, %arg7: memref<8x1xf32, #tpu.memory_space<vmem>>, %arg8: memref<2x256xf32, #tpu.memory_space<vmem>>) attributes {dimension_semantics = [#tpu.dimension_semantics<parallel>], iteration_bounds = array<i64: 4>, scalar_prefetch = 0 : i64, scratch_operands = 0 : i64, tpu.core_type = #tpu.core_type<tc>, window_params = [{transform_indices = @transform_0, window_bounds = array<i64: 8, 256>}, {pipeline_mode = #tpu.pipeline_mode<synchronous>, transform_indices = @transform_1, window_bounds = array<i64: 8, 8>}, {pipeline_mode = #tpu.pipeline_mode<synchronous>, transform_indices = @transform_2, window_bounds = array<i64: 8, 8>}, {pipeline_mode = #tpu.pipeline_mode<synchronous>, transform_indices = @transform_3, window_bounds = array<i64: 8, 8>}, {pipeline_mode = #tpu.pipeline_mode<synchronous>, transform_indices = @transform_4, window_bounds = array<i64: 8, 8>}, {pipeline_mode = #tpu.pipeline_mode<synchronous>, transform_indices = @transform_5, window_bounds = array<i64: 8, 1>}, {pipeline_mode = #tpu.pipeline_mode<synchronous>, transform_indices = @transform_6, window_bounds = array<i64: 8, 1>}, {transform_indices = @transform_7, window_bounds = array<i64: 2, 256>}]} {
    %c0 = arith.constant 0 : index
    %c0_0 = arith.constant 0 : index
    %0 = vector.load %arg1[%c0, %c0_0] : memref<8x256xf32, #tpu.memory_space<vmem>>, vector<8x256xf32>
    %c0_1 = arith.constant 0 : index
    %c0_2 = arith.constant 0 : index
    %1 = vector.load %arg2[%c0_1, %c0_2] : memref<8x8xf32, #tpu.memory_space<vmem>>, vector<8x8xf32>
    %c0_3 = arith.constant 0 : index
    %c0_4 = arith.constant 0 : index
    %2 = vector.load %arg3[%c0_3, %c0_4] : memref<8x8xf32, #tpu.memory_space<vmem>>, vector<8x8xf32>
    %cst = arith.constant 0.000000e+00 : f32
    %3 = vector.broadcast %cst : f32 to vector<8x256xf32>
    %4 = vector.extract_strided_slice %0 {offsets = [0, 0], sizes = [1, 256], strides = [1, 1]} : vector<8x256xf32> to vector<1x256xf32>
    %5 = vector.extract_strided_slice %1 {offsets = [0, 0], sizes = [8, 1], strides = [1, 1]} : vector<8x8xf32> to vector<8x1xf32>
    %6 = vector.broadcast %4 : vector<1x256xf32> to vector<8x256xf32>
    %7 = vector.broadcast %5 : vector<8x1xf32> to vector<8x256xf32>
    %8 = arith.subf %6, %7 : vector<8x256xf32>
    %9 = vector.extract_strided_slice %2 {offsets = [0, 0], sizes = [8, 1], strides = [1, 1]} : vector<8x8xf32> to vector<8x1xf32>
    %10 = arith.mulf %8, %8 : vector<8x256xf32>
    %11 = vector.broadcast %9 : vector<8x1xf32> to vector<8x256xf32>
    %12 = arith.mulf %11, %10 : vector<8x256xf32>
    %13 = arith.addf %3, %12 : vector<8x256xf32>
    %14 = vector.extract_strided_slice %0 {offsets = [1, 0], sizes = [1, 256], strides = [1, 1]} : vector<8x256xf32> to vector<1x256xf32>
    %15 = vector.extract_strided_slice %1 {offsets = [0, 1], sizes = [8, 1], strides = [1, 1]} : vector<8x8xf32> to vector<8x1xf32>
    %16 = vector.broadcast %14 : vector<1x256xf32> to vector<8x256xf32>
    %17 = vector.broadcast %15 : vector<8x1xf32> to vector<8x256xf32>
    %18 = arith.subf %16, %17 : vector<8x256xf32>
    %19 = vector.extract_strided_slice %2 {offsets = [0, 1], sizes = [8, 1], strides = [1, 1]} : vector<8x8xf32> to vector<8x1xf32>
    %20 = arith.mulf %18, %18 : vector<8x256xf32>
    %21 = vector.broadcast %19 : vector<8x1xf32> to vector<8x256xf32>
    %22 = arith.mulf %21, %20 : vector<8x256xf32>
    %23 = arith.addf %13, %22 : vector<8x256xf32>
    %24 = vector.extract_strided_slice %0 {offsets = [2, 0], sizes = [1, 256], strides = [1, 1]} : vector<8x256xf32> to vector<1x256xf32>
    %25 = vector.extract_strided_slice %1 {offsets = [0, 2], sizes = [8, 1], strides = [1, 1]} : vector<8x8xf32> to vector<8x1xf32>
    %26 = vector.broadcast %24 : vector<1x256xf32> to vector<8x256xf32>
    %27 = vector.broadcast %25 : vector<8x1xf32> to vector<8x256xf32>
    %28 = arith.subf %26, %27 : vector<8x256xf32>
    %29 = vector.extract_strided_slice %2 {offsets = [0, 2], sizes = [8, 1], strides = [1, 1]} : vector<8x8xf32> to vector<8x1xf32>
    %30 = arith.mulf %28, %28 : vector<8x256xf32>
    %31 = vector.broadcast %29 : vector<8x1xf32> to vector<8x256xf32>
    %32 = arith.mulf %31, %30 : vector<8x256xf32>
    %33 = arith.addf %23, %32 : vector<8x256xf32>
    %34 = vector.extract_strided_slice %0 {offsets = [3, 0], sizes = [1, 256], strides = [1, 1]} : vector<8x256xf32> to vector<1x256xf32>
    %35 = vector.extract_strided_slice %1 {offsets = [0, 3], sizes = [8, 1], strides = [1, 1]} : vector<8x8xf32> to vector<8x1xf32>
    %36 = vector.broadcast %34 : vector<1x256xf32> to vector<8x256xf32>
    %37 = vector.broadcast %35 : vector<8x1xf32> to vector<8x256xf32>
    %38 = arith.subf %36, %37 : vector<8x256xf32>
    %39 = vector.extract_strided_slice %2 {offsets = [0, 3], sizes = [8, 1], strides = [1, 1]} : vector<8x8xf32> to vector<8x1xf32>
    %40 = arith.mulf %38, %38 : vector<8x256xf32>
    %41 = vector.broadcast %39 : vector<8x1xf32> to vector<8x256xf32>
    %42 = arith.mulf %41, %40 : vector<8x256xf32>
    %43 = arith.addf %33, %42 : vector<8x256xf32>
    %44 = vector.extract_strided_slice %0 {offsets = [4, 0], sizes = [1, 256], strides = [1, 1]} : vector<8x256xf32> to vector<1x256xf32>
    %45 = vector.extract_strided_slice %1 {offsets = [0, 4], sizes = [8, 1], strides = [1, 1]} : vector<8x8xf32> to vector<8x1xf32>
    %46 = vector.broadcast %44 : vector<1x256xf32> to vector<8x256xf32>
    %47 = vector.broadcast %45 : vector<8x1xf32> to vector<8x256xf32>
    %48 = arith.subf %46, %47 : vector<8x256xf32>
    %49 = vector.extract_strided_slice %2 {offsets = [0, 4], sizes = [8, 1], strides = [1, 1]} : vector<8x8xf32> to vector<8x1xf32>
    %50 = arith.mulf %48, %48 : vector<8x256xf32>
    %51 = vector.broadcast %49 : vector<8x1xf32> to vector<8x256xf32>
    %52 = arith.mulf %51, %50 : vector<8x256xf32>
    %53 = arith.addf %43, %52 : vector<8x256xf32>
    %54 = vector.extract_strided_slice %0 {offsets = [5, 0], sizes = [1, 256], strides = [1, 1]} : vector<8x256xf32> to vector<1x256xf32>
    %55 = vector.extract_strided_slice %1 {offsets = [0, 5], sizes = [8, 1], strides = [1, 1]} : vector<8x8xf32> to vector<8x1xf32>
    %56 = vector.broadcast %54 : vector<1x256xf32> to vector<8x256xf32>
    %57 = vector.broadcast %55 : vector<8x1xf32> to vector<8x256xf32>
    %58 = arith.subf %56, %57 : vector<8x256xf32>
    %59 = vector.extract_strided_slice %2 {offsets = [0, 5], sizes = [8, 1], strides = [1, 1]} : vector<8x8xf32> to vector<8x1xf32>
    %60 = arith.mulf %58, %58 : vector<8x256xf32>
    %61 = vector.broadcast %59 : vector<8x1xf32> to vector<8x256xf32>
    %62 = arith.mulf %61, %60 : vector<8x256xf32>
    %63 = arith.addf %53, %62 : vector<8x256xf32>
    %64 = vector.extract_strided_slice %0 {offsets = [6, 0], sizes = [1, 256], strides = [1, 1]} : vector<8x256xf32> to vector<1x256xf32>
    %65 = vector.extract_strided_slice %1 {offsets = [0, 6], sizes = [8, 1], strides = [1, 1]} : vector<8x8xf32> to vector<8x1xf32>
    %66 = vector.broadcast %64 : vector<1x256xf32> to vector<8x256xf32>
    %67 = vector.broadcast %65 : vector<8x1xf32> to vector<8x256xf32>
    %68 = arith.subf %66, %67 : vector<8x256xf32>
    %69 = vector.extract_strided_slice %2 {offsets = [0, 6], sizes = [8, 1], strides = [1, 1]} : vector<8x8xf32> to vector<8x1xf32>
    %70 = arith.mulf %68, %68 : vector<8x256xf32>
    %71 = vector.broadcast %69 : vector<8x1xf32> to vector<8x256xf32>
    %72 = arith.mulf %71, %70 : vector<8x256xf32>
    %73 = arith.addf %63, %72 : vector<8x256xf32>
    %74 = vector.extract_strided_slice %0 {offsets = [7, 0], sizes = [1, 256], strides = [1, 1]} : vector<8x256xf32> to vector<1x256xf32>
    %75 = vector.extract_strided_slice %1 {offsets = [0, 7], sizes = [8, 1], strides = [1, 1]} : vector<8x8xf32> to vector<8x1xf32>
    %76 = vector.broadcast %74 : vector<1x256xf32> to vector<8x256xf32>
    %77 = vector.broadcast %75 : vector<8x1xf32> to vector<8x256xf32>
    %78 = arith.subf %76, %77 : vector<8x256xf32>
    %79 = vector.extract_strided_slice %2 {offsets = [0, 7], sizes = [8, 1], strides = [1, 1]} : vector<8x8xf32> to vector<8x1xf32>
    %80 = arith.mulf %78, %78 : vector<8x256xf32>
    %81 = vector.broadcast %79 : vector<8x1xf32> to vector<8x256xf32>
    %82 = arith.mulf %81, %80 : vector<8x256xf32>
    %83 = arith.addf %73, %82 : vector<8x256xf32>
    %cst_5 = arith.constant 0.000000e+00 : f32
    %84 = vector.broadcast %cst_5 : f32 to vector<8x256xf32>
    %85 = arith.subf %84, %83 : vector<8x256xf32>
    %86 = math.exp %85 : vector<8x256xf32>
    %cst_6 = arith.constant -2.800000e+01 : f32
    %87 = vector.broadcast %cst_6 : f32 to vector<8x256xf32>
    %88 = arith.addf %86, %87 : vector<8x256xf32>
    %cst_7 = arith.constant dense<0.000000e+00> : vector<256xf32>
    %89 = vector.multi_reduction <add>, %88, %cst_7 [0] : vector<8x256xf32> to vector<256xf32>
    %90 = vector.shape_cast %89 : vector<256xf32> to vector<1x256xf32>
    %cst_8 = arith.constant 1.000000e+00 : f32
    %91 = vector.broadcast %cst_8 : f32 to vector<1x256xf32>
    %92 = arith.divf %91, %90 : vector<1x256xf32>
    %c0_9 = arith.constant 0 : index
    %c0_10 = arith.constant 0 : index
    %93 = vector.load %arg4[%c0_9, %c0_10] : memref<8x8xf32, #tpu.memory_space<vmem>>, vector<8x8xf32>
    %cst_11 = arith.constant dense<0.000000e+00> : vector<8x256xf32>
    %94 = tpu.matmul %93, %0, %cst_11 {dimension_numbers = #tpu.dot_dimension_numbers<[1], [0], [0], [1], [0, 0, 1, 1], [], []>, precision = #tpu.contract_precision<fp32>} : vector<8x8xf32>, vector<8x256xf32>, vector<8x256xf32> -> vector<8x256xf32>
    %c0_12 = arith.constant 0 : index
    %c0_13 = arith.constant 0 : index
    %95 = vector.load %arg6[%c0_12, %c0_13] : memref<8x1xf32, #tpu.memory_space<vmem>>, vector<8x1xf32>
    %96 = vector.broadcast %95 : vector<8x1xf32> to vector<8x256xf32>
    %97 = arith.addf %94, %96 : vector<8x256xf32>
    %c0_14 = arith.constant 0 : index
    %c0_15 = arith.constant 0 : index
    %98 = vector.load %arg5[%c0_14, %c0_15] : memref<8x8xf32, #tpu.memory_space<vmem>>, vector<8x8xf32>
    %cst_16 = arith.constant dense<0.000000e+00> : vector<8x256xf32>
    %99 = tpu.matmul %98, %0, %cst_16 {dimension_numbers = #tpu.dot_dimension_numbers<[1], [0], [0], [1], [0, 0, 1, 1], [], []>, precision = #tpu.contract_precision<fp32>} : vector<8x8xf32>, vector<8x256xf32>, vector<8x256xf32> -> vector<8x256xf32>
    %c0_17 = arith.constant 0 : index
    %c0_18 = arith.constant 0 : index
    %100 = vector.load %arg7[%c0_17, %c0_18] : memref<8x1xf32, #tpu.memory_space<vmem>>, vector<8x1xf32>
    %101 = vector.broadcast %100 : vector<8x1xf32> to vector<8x256xf32>
    %102 = arith.addf %99, %101 : vector<8x256xf32>
    %103 = arith.mulf %88, %97 : vector<8x256xf32>
    %cst_19 = arith.constant dense<0.000000e+00> : vector<256xf32>
    %104 = vector.multi_reduction <add>, %103, %cst_19 [0] : vector<8x256xf32> to vector<256xf32>
    %105 = vector.shape_cast %104 : vector<256xf32> to vector<1x256xf32>
    %106 = arith.mulf %105, %92 : vector<1x256xf32>
    %107 = arith.mulf %88, %102 : vector<8x256xf32>
    %cst_20 = arith.constant dense<0.000000e+00> : vector<256xf32>
    %108 = vector.multi_reduction <add>, %107, %cst_20 [0] : vector<8x256xf32> to vector<256xf32>
    %109 = vector.shape_cast %108 : vector<256xf32> to vector<1x256xf32>
    %110 = arith.mulf %109, %92 : vector<1x256xf32>
    %111 = tpu.concatenate %106, %110 in 0 : vector<1x256xf32>, vector<1x256xf32> -> vector<2x256xf32>
    %c0_21 = arith.constant 0 : index
    %c0_22 = arith.constant 0 : index
    %112 = vector.load %arg8[%c0_21, %c0_22] : memref<2x256xf32, #tpu.memory_space<vmem>>, vector<2x256xf32>
    tpu.vector_store %arg8[%c0_21, %c0_22], %111 {strides = array<i32>} : memref<2x256xf32, #tpu.memory_space<vmem>>, vector<2x256xf32>,
    return
  }
  func.func @transform_0(%arg0: i32) -> (i32, i32) {
    %c0_i32 = arith.constant 0 : i32
    %c0_i32_0 = arith.constant 0 : i32
    return %c0_i32, %arg0 : i32, i32
  }
  func.func @transform_1(%arg0: i32) -> (i32, i32) {
    %c0_i32 = arith.constant 0 : i32
    %c0_i32_0 = arith.constant 0 : i32
    %c0_i32_1 = arith.constant 0 : i32
    return %c0_i32, %c0_i32_0 : i32, i32
  }
  func.func @transform_2(%arg0: i32) -> (i32, i32) {
    %c0_i32 = arith.constant 0 : i32
    %c0_i32_0 = arith.constant 0 : i32
    %c0_i32_1 = arith.constant 0 : i32
    return %c0_i32, %c0_i32_0 : i32, i32
  }
  func.func @transform_3(%arg0: i32) -> (i32, i32) {
    %c0_i32 = arith.constant 0 : i32
    %c0_i32_0 = arith.constant 0 : i32
    %c0_i32_1 = arith.constant 0 : i32
    return %c0_i32, %c0_i32_0 : i32, i32
  }
  func.func @transform_4(%arg0: i32) -> (i32, i32) {
    %c0_i32 = arith.constant 0 : i32
    %c0_i32_0 = arith.constant 0 : i32
    %c0_i32_1 = arith.constant 0 : i32
    return %c0_i32, %c0_i32_0 : i32, i32
  }
  func.func @transform_5(%arg0: i32) -> (i32, i32) {
    %c0_i32 = arith.constant 0 : i32
    %c0_i32_0 = arith.constant 0 : i32
    %c0_i32_1 = arith.constant 0 : i32
    return %c0_i32, %c0_i32_0 : i32, i32
  }
  func.func @transform_6(%arg0: i32) -> (i32, i32) {
    %c0_i32 = arith.constant 0 : i32
    %c0_i32_0 = arith.constant 0 : i32
    %c0_i32_1 = arith.constant 0 : i32
    return %c0_i32, %c0_i32_0 : i32, i32
  }
  func.func @transform_7(%arg0: i32) -> (i32, i32) {
    %c0_i32 = arith.constant 0 : i32
    %c0_i32_0 = arith.constant 0 : i32
    return %c0_i32, %arg0 : i32, i32
  }
}

</mosaic_0001>

<bundles_post_ra>
// kernel: tpu_custom_call.1
= control target key start
LH: loop header
LB: loop body
LE: loop exit
PB: predicated region body
PF: predicated region fallthrough
CT: control target
= control target key end

     0   :  { %s1866_s0 = inlined_call_operand.hbm [shape: f32[8,1024], index: 0, kind: input, shape index: {}]   ;;  %s1867_s1 = inlined_call_operand.vmem [shape: f32[8,8], index: 1, kind: input, shape index: {}]   ;;  %s1868_s2 = inlined_call_operand.vmem [shape: f32[8,8], index: 2, kind: input, shape index: {}]   ;;  %s1869_s3 = inlined_call_operand.hbm [shape: f32[8,8], index: 3, kind: input, shape index: {}]   ;;  %s1870_s4 = inlined_call_operand.hbm [shape: f32[8,8], index: 4, kind: input, shape index: {}]   ;;  %s1871_s5 = inlined_call_operand.vmem [shape: f32[8,1], index: 5, kind: input, shape index: {}]   ;;  %s1872_s6 = inlined_call_operand.vmem [shape: f32[8,1], index: 6, kind: input, shape index: {}]   ;;  %s1873_s7 = inlined_call_operand.hbm [shape: f32[2,1024], index: 7, kind: output, shape index: {}]  }
   0x1   :  { %1874 = sst [smem:[#allocation12_spill]] %s1869_s3 }
   0x2   :  { %12 = vsyncpa [#allocation3], 0 }
   0x3   :  { %14 = vsyncpa [#allocation3 + $0x1], 0 }
   0x4   :  { %15 = vsyncpa [#allocation6], 0 }
   0x5   :  { %16 = vsyncpa [#allocation4], 0 }
   0x6   :  { %18 = vsyncpa [#allocation4 + $0x1], 0  ;;  %s1613_s24 = smov 0   ;;  %s1615_s25 = smov 0  }
   0x7   :  { %s1617_s26 = smov 0   ;;  %s1619_s27 = smov 0  }
   0x8 LB: > { %s1634_s28 = sadd.s32 4294967295, %s1561_s27   ;;  %s1281_s29 = sadd.s32 4294967294, %s1561_s27   ;;  %s1561_s27 = sphi %s1619_s27, %s1884_s27   ;;  %s1557_s26 = sphi %s1617_s26, %s1883_s26   ;;  %s1553_s25 = sphi %s1615_s25, %s1882_s25   ;;  %s1549_s24 = sphi %s1613_s24, %s1881_s24  }
   0x9   : > { %p44_p0 = scmp.ne.s32.totalorder %s1553_s25, %s1549_s24  ;;  %p45_p1 = scmp.eq.s32.totalorder %s1634_s28, 0 }
   0xa   : > { %p194_p2 = scmp.eq.s32.totalorder %s1634_s28, 3  ;;  %p200_p3 = scmp.eq.s32.totalorder %s1281_s29, 3 }
   0xb   : > { %p1643_p4 = por %p45_p1, %p44_p0  ;;  %p1282_p5 = scmp.ge.s32.totalorder %s1561_s27, 1 }
   0xc   : > { %p1648_p6 = por %p200_p3, %p44_p0  ;;  %p207_p7 = scmp.lt.s32.totalorder %s1561_s27, 5 }
   0xd   : > { %s1877_s3 = sld [smem:[#allocation12_spill]]  ;;  %s1563_s13 = smov [#allocation5]  }
   0xe   : > { %p1656_p8 = pnand %p1282_p5, %p207_p7  ;;  %s227_s14 = sshll.u32 %s1563_s13, 4  ;;  %s228_s14 = int_to_ptr.vmem [resolvable:$true] %s227_s14 }
   0xf   : > { %s237_s17 = sshll.u32 %s1870_s4, 4  ;;  %s1564_s18 = smov [#allocation7]   ;;  %s238_s17 = int_to_ptr.hbm [resolvable:$true] %s237_s17 }
  0x10   : > { %p1313_p9 = pneg %p1656_p8  ;;  %s239_s19 = sshll.u32 %s1564_s18, 4  ;;  %s240_s19 = int_to_ptr.vmem [resolvable:$true] %s239_s19 }
  0x11   : > { %s1668_s20 = sadd.s32 1, %s1561_s27   ;;  %s31_s21 = sadd.s32 1, %s1557_s26 }
  0x12   : > { %p1314_p10 = pnand %p1313_p9, %p45_p1  ;;  %s28_s22 = ssub.s32 %s1561_s27, %s1668_s20 }
  0x13   : > { %s225_s11 = sshll.u32 %s1877_s3, 4  ;;  %p38_p11 = scmp.ne.s32.totalorder %s1557_s26, %s1553_s25  ;;  %s226_s11 = int_to_ptr.hbm [resolvable:$true] %s225_s11 }
  0x14   : > { %1316 = dma.hbm_to_vmem [thread:$0]  (!%p1314_p10), %s226_s11, 128, %s228_s14, [#allocation6]  }
  0x15   : > { %1319 = dma.hbm_to_vmem [thread:$0]  (!%p1314_p10), %s238_s17, 128, %s240_s19, [#allocation6]  }
  0x16   : > { %p29_p12 = scmp.eq.s32.totalorder %s28_s22, 0  ;;  %p39_p13 = scmp.eq.s32.totalorder %s1561_s27, 0 }
  0x17   : > { %p1678_p0 = por %p194_p2, %p38_p11  ;;  %p1330_p3 = scmp.lt.s32.totalorder %s1561_s27, 4 }
  0x18   : > { %s1684_s29 = scalar_select %p29_p12, %s1557_s26, %s31_s21  }
  0x19   : > { %p40_p5 = por %p39_p13, %p38_p11  ;;  %s256_s9 = sand.u32 1, %s1557_s26  }
  0x1a   : > { %s1286_s10 = sshll.u32 %s256_s9, 4  ;;  %s1299_s11 = sshll.u32 %s1561_s27, 4 }
  0x1b   : > { %s265_s15 = scalar_lea.hbm %s1866_s0, %s1299_s11  ;;  %s260_s16 = scalar_lea.vmem [#allocation2], %s1286_s10 }
  0x1c   : > { %s269_s17 = sshll.u32 %s260_s16, 4  ;;  %s267_s18 = sshll.u32 %s265_s15, 4  ;;  %s270_s17 = int_to_ptr.vmem [resolvable:$true] %s269_s17  ;;  %s268_s18 = int_to_ptr.hbm [resolvable:$true] %s267_s18 }
  0x1d   : > { %p1691_p2 = pnand %p1330_p3, %p40_p5  ;;  %s257_s21 = scalar_lea.sflag [#allocation3], %s256_s9 }
  0x1e   : > { %s1461_s22 = sshra.s32 %s268_s18, 4  ;;  %s1468_s13 = scalar_lea.hbm %s1866_s0, 64  ;;  %s1462_s22 = int_to_ptr.hbm [resolvable:$true] %s1461_s22 }
  0x1f   : > { %s1463_s3 = scalar_lea.hbm %s1462_s22, 16  ;;  %p1465_p9 = pneg %p1691_p2 }
  0x20   : > { %p1464_p7 = scmp.ne.s32.totalorder %s1462_s22, %s1463_s3  ;;  %p1469_p12 = scmp.lt.s32.totalorder %s1462_s22, %s1866_s0 }
  0x21   : > { %p1470_p13 = scmp.lt.s32.totalorder %s1468_s13, %s1463_s3 }
  0x22   : > { %p1466_p10 = pnand %p1465_p9, %p1464_p7 }
  0x23   : > { %p1471_p3 = por %p1470_p13, %p1469_p12 }
  0x24   : > { %p1467_p11 = pneg %p1466_p10 }
  0x26   : > { %p1472_p5 = pnand %p1471_p3, %p1467_p11 }
  0x28   : > { %1475 = shalt.err (!%p1472_p5)
}
  0x29   : > { %1323 = dma.hbm_to_vmem [thread:$0]  (!%p1691_p2), %s268_s18, 256, %s270_s17, %s257_s21  }
  0x2a   : > { %278 = sbr.rel (%p1656_p8) target bundleno = 270 (0x10e), region = 48  ;;  %s1708_s9 = sand.u32 (!%p1656_p8), 1, %s1553_s25  }
  0x2b   : > { %s1290_s16 = sshll.u32 (!%p1656_p8), %s1708_s9, 4  ;;  %s281_s11 = scalar_lea.sflag (!%p1656_p8), [#allocation3], %s1708_s9 }
  0x2c   : > { %s284_s10 = scalar_lea.vmem (!%p1656_p8), [#allocation2], %s1290_s16 }
  0x2f   : > { %1536 = dma.done.wait (%p1643_p4), %s281_s11, 256  }
  0x30   : > { %1538 = vsyncadd (%p1643_p4), %s281_s11, 4294967040 }
  0x31   : > { %1540 = dma.done.wait (%p45_p1), [#allocation6], 256  }
  0x32   : > { %1542 = vsyncadd (%p45_p1), [#allocation6], 4294967040  ;;  %v1565_v0 = vmov 2   ;;  %v1566_v1 = vmov 0   ;;  %v1567_v2 = vmov 1   ;;  %vm535_vm0 = vcmask 64512  }
  0x33   : > { %1378 = vset.pattern.permute.xlu1 %v1565_v0  ;;  %1376 = vset.pattern.permute.xlu0 %v1566_v1  ;;  %v1724_v3 = vld [vmem:[%s1867_s1] sm:$0xff]  ;;  %v1738_v8 = vld [vmem:[%s284_s10 + $0x8] sm:$0xff]  ;;  %v1568_v25 = vmov 3   ;;  %v1569_v29 = vmov 4   ;;  %v1570_v31 = vmov 5   ;;  %v1571_v32 = vmov 7  }
  0x34   : > { %1380 = vset.pattern.permute.xlu2 %v1567_v2  ;;  %v1726_v4 = vld [vmem:[%s284_s10] sm:$0xff]  ;;  %373 = vperm.xlu1 %1378, %v1724_v3   ;;  %v1742_v10 = vand.u32 4294901760, %v1738_v8  ;;  %v831_v24 = vld [vmem:[#allocation7] sm:$0xff]  ;;  %v1572_v35 = vmov 6   ;;  %v353_v46 = vperm.slane %v1738_v8, 1  ;;  %v333_v48 = vperm.slane %v1738_v8, 0 }
  0x35   : > { %336 = vperm.xlu0 %1376, %v1724_v3   ;;  %v1731_v5 = vand.u32 4294901760, %v1726_v4  ;;  %v1736_v6 = vld [vmem:[%s1868_s2] sm:$0xff]  ;;  %v839_v26 = vsel %vm535_vm0, %v831_v24, 0  ;;  %v352_v45 = vperm.slane %v1726_v4, 1  ;;  %v332_v47 = vperm.slane %v1726_v4, 0  ;;  %s1293_s13 = sshll.u32 %s1708_s9, 2 }
  0x36   : > { %v528_v7 = vld [vmem:[#allocation5] sm:$0xff]  ;;  %363 = vperm.xlu2 %1380, %v1736_v6   ;;  %v1751_v13 = vsub.f32 %v1738_v8, %v1742_v10  ;;  %v858_v27 = vand.u32 4294901760, %v839_v26  ;;  %v370_v51 = vperm.slane %v1726_v4, 2  ;;  %v371_v52 = vperm.slane %v1738_v8, 2  ;;  %s1300_s14 = sshll.u32 %s1634_s28, 2  ;;  %s325_s28 = scalar_lea.vmem [#allocation8], %s1293_s13 }
  0x37   : > { %v537_v9 = vsel %vm535_vm0, %v528_v7, 0  ;;  %v581_v11 = vsub.f32 %v1726_v4, %v1731_v5  ;;  %555 = vmatpush.msra.mxu0 %v1731_v5  ;;  %631 = vmatpush.msra.mxu3 %v1731_v5  ;;  %v529_v36 = vld [vmem:[%s1871_s5] sm:$0xff]  ;;  %v406_v7 = vperm.slane %v1726_v4, 4  ;;  %s1187_s11 = scalar_lea.hbm %s1873_s7, %s1300_s14  ;;  %vm1165_vm9 = vcmask 1040384   ;;  %s1189_s10 = sshll.u32 %s325_s28, 4  ;;  %s1190_s10 = int_to_ptr.vmem [resolvable:$true] %s1189_s10 }
  0x38   : > { %v556_v12 = vand.u32 4294901760, %v537_v9  ;;  %v728_v16 = vand.u32 4294901760, %v1751_v13  ;;  %v859_v28 = vsub.f32 %v839_v26, %v858_v27  ;;  %v832_v37 = vld [vmem:[%s1872_s6] sm:$0xff]  ;;  %s1191_s3 = sshll.u32 %s1187_s11, 4  ;;  %vm1171_vm10 = vcmask 1041408   ;;  %s1176_s12 = scalar_lea.sflag [#allocation4], %s1708_s9  ;;  %s1192_s3 = int_to_ptr.hbm [resolvable:$true] %s1191_s3 }
  0x39   : > { %608 = vmatpush.msra.mxu2 %v581_v11  ;;  %v582_v15 = vand.u32 4294901760, %v581_v11  ;;  %s1505_s30 = sshra.s32 %s1192_s3, 4  ;;  %s1511_s21 = scalar_lea.hbm %s1873_s7, 16  ;;  %s1506_s30 = int_to_ptr.hbm [resolvable:$true] %s1505_s30 }
  0x3a   : > { %v557_v14 = vsub.f32 %v537_v9, %v556_v12  ;;  %v729_v19 = vsub.f32 %v1751_v13, %v728_v16  ;;  %v860_v30 = vand.u32 4294901760, %v859_v28  ;;  %v407_v9 = vperm.slane %v1738_v8, 4  ;;  %s1507_s17 = scalar_lea.hbm %s1506_s30, 4  ;;  %p1512_p2 = scmp.lt.s32.totalorder %s1506_s30, %s1873_s7 }
  0x3b   : > { %701 = vmatpush.msrb.mxu2 %v1742_v10  ;;  %v583_v18 = vsub.f32 %v581_v11, %v582_v15  ;;  %657 = vmatpush.msrb.mxu0 %v582_v15  ;;  %p1508_p1 = scmp.ne.s32.totalorder %s1506_s30, %s1507_s17  ;;  %p1513_p7 = scmp.lt.s32.totalorder %s1511_s21, %s1507_s17 }
  0x3c   : > { %611 = vmatmul.f32.vlgmr.msra.gmra.mxu2 %v557_v14  ;;  %v558_v17 = vand.u32 4294901760, %v557_v14  ;;  %1379 = vset.pattern.permute.xlu1 %v1566_v1  ;;  %v730_v22 = vand.u32 4294901760, %v729_v19  ;;  %v861_v33 = vsub.f32 %v859_v28, %v860_v30 }
  0x3d   : > { %803 = vmatpush.msra.mxu2 %v728_v16  ;;  %1377 = vset.pattern.permute.xlu0 %v1567_v2  ;;  %v584_v21 = vand.u32 4294901760, %v583_v18  ;;  %p1509_p4 = pnand %p1508_p1, %p1678_p0  ;;  %p1514_p9 = por %p1513_p7, %p1512_p2 }
  0x3e   : > { %v559_v20 = vsub.f32 %v557_v14, %v558_v17  ;;  %345 = vperm.xlu1 %1379, %v1736_v6   ;;  %355 = vperm.xlu0 %1377, %v1724_v3   ;;  %v862_v34 = vand.u32 4294901760, %v861_v33  ;;  %v460_v33 = vperm.slane %v1726_v4, 7 }
  0x3f   : > { %635 = vmatmul.f32.vlgmr.msra.gmra.mxu3 %v558_v17  ;;  %585 = vmatpush.msra.mxu1 %v584_v21  ;;  %p1510_p8 = pneg %p1509_p4 }
  0x40   : > { %v560_v23 = vand.u32 4294901760, %v559_v20  ;;  %587 = vmatmul.f32.vlgmr.msra.gmra.mxu1 %v556_v12  ;;  %731 = vmatpush.msrb.mxu3 %v730_v22 }
  0x41   : > { %679 = vmatpush.msrb.mxu1 %v1731_v5  ;;  %1381 = vset.pattern.permute.xlu2 %v1568_v25  ;;  %p1515_p10 = pnand %p1514_p9, %p1510_p8 }
  0x42   : > { %561 = vmatmul.f32.vlgmr.msra.gmra.mxu0 %v560_v23  ;;  %825 = vmatpush.msra.mxu3 %v1742_v10 }
  0x43   : > { %754 = vmatpush.msra.mxu0 %v1751_v13  ;;  %391 = vperm.xlu2 %1381, %v1724_v3  }
  0x44   : > { %707 = vmatmul.f32.vlgmr.msrb.gmra.mxu2 %v560_v23  ;;  %777 = vmatpush.msra.mxu1 %v1742_v10 }
  0x45   : > { %910 = vmatpush.msrb.mxu2 %v581_v11  ;;  %v424_v11 = vperm.slane %v1726_v4, 5 }
  0x46   : > { %1382 = vset.pattern.permute.xlu1 %v1565_v0  ;;  %1384 = vset.pattern.permute.xlu0 %v1568_v25  ;;  %v388_v0 = vperm.slane %v1726_v4, 3 }
  0x47   : > { %381 = vperm.xlu1 %1382, %v1736_v6   ;;  %399 = vperm.xlu0 %1384, %v1736_v6  }
  0x48   : > { %733 = vmatmul.f32.vlgmr.msrb.gmra.mxu3 %v556_v12  ;;  %681 = vmatmul.f32.vlgmr.msrb.gmra.mxu1 %v556_v12 }
  0x49   : > { %933 = vmatpush.msrb.mxu3 %v1731_v5  ;;  %887 = vmatpush.msrb.mxu1 %v584_v21 }
  0x4a   : > { %659 = vmatmul.f32.vlgmr.msrb.gmra.mxu0 %v556_v12 }
  0x4b   : > { %857 = vmatpush.msrb.mxu0 %v1731_v5  ;;  %1383 = vset.pattern.permute.xlu2 %v1569_v29 }
  0x4c   : > { %805 = vmatmul.f32.vlgmr.msra.gmra.mxu2 %v556_v12  ;;  %409 = vperm.xlu2 %1383, %v1724_v3  }
  0x4d   : > { %1003 = vmatpush.msra.mxu2 %v1742_v10 }
  0x4f   : > { %1385 = vset.pattern.permute.xlu1 %v1570_v31  ;;  %1388 = vset.pattern.permute.xlu0 %v1571_v32 }
  0x50   : > { %427 = vperm.xlu1 %1385, %v1724_v3   ;;  %827 = vmatmul.f32.vlgmr.msra.gmra.mxu3 %v556_v12  ;;  %v425_v12 = vperm.slane %v1738_v8, 5 }
  0x51   : > { %781 = vmatmul.f32.vlgmr.msra.gmra.mxu1 %v558_v17  ;;  %463 = vperm.xlu0 %1388, %v1724_v3  }
  0x52   : > { %757 = vmatmul.f32.vlgmr.msra.gmra.mxu0 %v557_v14  ;;  %1033 = vmatpush.msra.mxu3 %v730_v22 }
  0x53   : > { %959 = vmatpush.msra.mxu0 %v582_v15  ;;  %981 = vmatpush.msra.mxu1 %v1731_v5 }
  0x54   : > { %913 = vmatmul.f32.vlgmr.msrb.gmra.mxu2 %v859_v28  ;;  %417 = vperm.xlu2 %1383, %v1736_v6  }
  0x55   : > { %1105 = vmatpush.msrb.mxu2 %v728_v16 }
  0x58   : > { %1386 = vset.pattern.permute.xlu1 %v1572_v35  ;;  %937 = vmatmul.f32.vlgmr.msrb.gmra.mxu3 %v860_v30 }
  0x59   : > { %445 = vperm.xlu1 %1386, %v1724_v3   ;;  %889 = vmatmul.f32.vlgmr.msrb.gmra.mxu1 %v858_v27 }
  0x5a   : > { %863 = vmatmul.f32.vlgmr.msrb.gmra.mxu0 %v862_v34  ;;  %1127 = vmatpush.msrb.mxu3 %v1742_v10 }
  0x5b   : > { %1056 = vmatpush.msrb.mxu0 %v1751_v13  ;;  %1079 = vmatpush.msrb.mxu1 %v1742_v10 }
  0x5c   : > { %1009 = vmatmul.f32.vlgmr.msra.gmra.mxu2 %v862_v34  ;;  %1392 = vset.pattern.permute.xlu0 %v1566_v1  ;;  %v461_v34 = vperm.slane %v1738_v8, 7 }
  0x5d   : > { %1387 = vset.pattern.permute.xlu2 %v1570_v31 }
  0x5e   : > { %435 = vperm.xlu2 %1387, %v1736_v6  }
  0x60   : > { %1035 = vmatmul.f32.vlgmr.msra.gmra.mxu3 %v858_v27 }
  0x61   : > { %453 = vperm.xlu1 %1386, %v1736_v6   ;;  %983 = vmatmul.f32.vlgmr.msra.gmra.mxu1 %v858_v27 }
  0x62   : > { %961 = vmatmul.f32.vlgmr.msra.gmra.mxu0 %v858_v27 }
  0x64   : > { %1107 = vmatmul.f32.vlgmr.msrb.gmra.mxu2 %v858_v27 }
  0x66   : > { %1389 = vset.pattern.permute.xlu2 %v1571_v32 }
  0x67   : > { %471 = vperm.xlu2 %1389, %v1736_v6  }
  0x68   : > { %1129 = vmatmul.f32.vlgmr.msrb.gmra.mxu3 %v858_v27 }
  0x69   : > { %1390 = vset.pattern.permute.xlu1 %v1566_v1  ;;  %1083 = vmatmul.f32.vlgmr.msrb.gmra.mxu1 %v860_v30 }
  0x6a   : > { %1059 = vmatmul.f32.vlgmr.msrb.gmra.mxu0 %v859_v28  ;;  %532 = vperm.xlu1 %1390, %v529_v36  }
  0x6f   : > { %1391 = vset.pattern.permute.xlu2 %v1566_v1  ;;  %v389_v1 = vperm.slane %v1738_v8, 3 }
  0x70   : > { %835 = vperm.xlu2 %1391, %v832_v37  }
  0x90   : > { %v364_v38 = vpop.permute.xlu2 %363 }
  0x9d   : > { %v392_v39 = vpop.permute.xlu2 %391 }
  0x9e   : > { %v394_v18 = vsub.f32 %v388_v0, %v392_v39  ;;  %v395_v19 = vsub.f32 %v389_v1, %v392_v39 }
  0xa0   : > { %v396_v35 = vmul.f32 %v394_v18, %v394_v18  ;;  %v397_v36 = vmul.f32 %v395_v19, %v395_v19 }
  0xa6   : > { %v374_v40 = vpop.permute.xlu1 %373  ;;  %v410_v42 = vpop.permute.xlu2 %409 }
  0xa7   : > { %v337_v41 = vpop.permute.xlu0 %336  ;;  %v376_v60 = vsub.f32 %v370_v51, %v374_v40  ;;  %v377_v61 = vsub.f32 %v371_v52, %v374_v40  ;;  %v412_v25 = vsub.f32 %v406_v7, %v410_v42  ;;  %v413_v26 = vsub.f32 %v407_v9, %v410_v42 }
  0xa8   : > { %v339_v55 = vsub.f32 %v332_v47, %v337_v41  ;;  %v340_v56 = vsub.f32 %v333_v48, %v337_v41  ;;  %v442_v42 = vperm.slane %v1726_v4, 6 }
  0xa9   : > { %v378_v14 = vmul.f32 %v376_v60, %v376_v60  ;;  %v379_v15 = vmul.f32 %v377_v61, %v377_v61  ;;  %v414_v40 = vmul.f32 %v412_v25, %v412_v25  ;;  %v415_v41 = vmul.f32 %v413_v26, %v413_v26 }
  0xaa   : > { %v341_v2 = vmul.f32 %v339_v55, %v339_v55  ;;  %v342_v3 = vmul.f32 %v340_v56, %v340_v56 }
  0xae   : > { %v1795_v50 = vpop.permute.xlu2 %417 }
  0xaf   : > { %v421_v4 = vmul.f32 %v1795_v50, %v415_v41 }
  0xb0   : > { %v346_v43 = vpop.permute.xlu1 %345  ;;  %v356_v44 = vpop.permute.xlu0 %355 }
  0xb1   : > { %v358_v53 = vsub.f32 %v352_v45, %v356_v44  ;;  %v359_v54 = vsub.f32 %v353_v46, %v356_v44  ;;  %v348_v20 = vmul.f32 %v346_v43, %v341_v2  ;;  %v349_v21 = vmul.f32 %v346_v43, %v342_v3 }
  0xb2   : > { %v443_v43 = vperm.slane %v1738_v8, 6 }
  0xb3   : > { %v360_v62 = vmul.f32 %v358_v53, %v358_v53  ;;  %v361_v63 = vmul.f32 %v359_v54, %v359_v54 }
  0xb5   : > { %v366_v16 = vmul.f32 %v364_v38, %v360_v62  ;;  %v367_v17 = vmul.f32 %v364_v38, %v361_v63  ;;  %v420_v63 = vmul.f32 %v1795_v50, %v414_v40 }
  0xb7   : > { %v368_v29 = vadd.f32 %v366_v16, %v348_v20  ;;  %v369_v30 = vadd.f32 %v367_v17, %v349_v21 }
  0xb8   : > { %v436_v6 = vpop.permute.xlu2 %435 }
  0xb9   : > { %v382_v49 = vpop.permute.xlu1 %381  ;;  %v400_v5 = vpop.permute.xlu0 %399 }
  0xba   : > { %v384_v22 = vmul.f32 %v382_v49, %v378_v14  ;;  %v385_v23 = vmul.f32 %v382_v49, %v379_v15  ;;  %v402_v45 = vmul.f32 %v400_v5, %v396_v35  ;;  %v403_v46 = vmul.f32 %v400_v5, %v397_v36 }
  0xbc   : > { %v386_v37 = vadd.f32 %v384_v22, %v368_v29  ;;  %v387_v38 = vadd.f32 %v385_v23, %v369_v30 }
  0xbd   : > { %v1799_v57 = vpop.f32.mrf.mxu1 }
  0xbe   : > { %v404_v54 = vadd.f32 %v402_v45, %v386_v37  ;;  %v405_v55 = vadd.f32 %v403_v46, %v387_v38 }
  0xbf   : > { %v1801_v58 = vpop.f32.mrf.mxu0  ;;  %v1803_v59 = vpop.f32.mrf.mxu2 }
  0xc0   : > { %v422_v5 = vadd.f32 %v420_v63, %v404_v54  ;;  %v423_v7 = vadd.f32 %v421_v4, %v405_v55 }
  0xc1   : > { %v472_v44 = vpop.permute.xlu2 %471 }
  0xc2   : > { %v428_v10 = vpop.permute.xlu1 %427  ;;  %v1811_v13 = vpop.f32.mrf.mxu3 }
  0xc3   : > { %v430_v31 = vsub.f32 %v424_v11, %v428_v10  ;;  %v431_v32 = vsub.f32 %v425_v12, %v428_v10  ;;  %v464_v39 = vpop.permute.xlu0 %463 }
  0xc4   : > { %v466_v52 = vsub.f32 %v460_v33, %v464_v39  ;;  %v467_v53 = vsub.f32 %v461_v34, %v464_v39 }
  0xc5   : > { %v1813_v24 = vpop.f32.mrf.mxu1  ;;  %v432_v47 = vmul.f32 %v430_v31, %v430_v31  ;;  %v433_v48 = vmul.f32 %v431_v32, %v431_v32 }
  0xc6   : > { %v468_v2 = vmul.f32 %v466_v52, %v466_v52  ;;  %v469_v3 = vmul.f32 %v467_v53, %v467_v53 }
  0xc7   : > { %v1815_v27 = vpop.f32.mrf.mxu0  ;;  %v1817_v28 = vpop.f32.mrf.mxu2  ;;  %v438_v8 = vmul.f32 %v436_v6, %v432_v47  ;;  %v439_v0 = vmul.f32 %v436_v6, %v433_v48 }
  0xc8   : > { %v474_v16 = vmul.f32 %v472_v44, %v468_v2  ;;  %v475_v17 = vmul.f32 %v472_v44, %v469_v3 }
  0xc9   : > { %v440_v11 = vadd.f32 %v438_v8, %v422_v5  ;;  %v441_v12 = vadd.f32 %v439_v0, %v423_v7 }
  0xca   : > { %v836_v20 = vpop.permute.xlu2 %835 }
  0xcb   : > { %v446_v49 = vpop.permute.xlu1 %445  ;;  %v734_v51 = vpop.f32.mrf.mxu3 }
  0xcc   : > { %v448_v56 = vsub.f32 %v442_v42, %v446_v49  ;;  %v449_v60 = vsub.f32 %v443_v43, %v446_v49 }
  0xce   : > { %v782_v62 = vpop.f32.mrf.mxu1  ;;  %v450_v9 = vmul.f32 %v448_v56, %v448_v56  ;;  %v451_v10 = vmul.f32 %v449_v60, %v449_v60 }
  0xcf   : > { %v758_v61 = vpop.f32.mrf.mxu0  ;;  %v806_v1 = vpop.f32.mrf.mxu2 }
  0xd3   : > { %v454_v14 = vpop.permute.xlu1 %453  ;;  %v828_v15 = vpop.f32.mrf.mxu3 }
  0xd4   : > { %v456_v18 = vmul.f32 %v454_v14, %v450_v9  ;;  %v457_v19 = vmul.f32 %v454_v14, %v451_v10 }
  0xd6   : > { %v458_v21 = vadd.f32 %v456_v18, %v440_v11  ;;  %v459_v50 = vadd.f32 %v457_v19, %v441_v12  ;;  %v890_v6 = vpop.f32.mrf.mxu1 }
  0xd7   : > { %v864_v22 = vpop.f32.mrf.mxu0  ;;  %v914_v23 = vpop.f32.mrf.mxu2 }
  0xd8   : > { %v865_v25 = vadd.f32 %v864_v22, %v836_v20  ;;  %v476_v26 = vadd.f32 %v474_v16, %v458_v21  ;;  %v477_v29 = vadd.f32 %v475_v17, %v459_v50 }
  0xda   : > { %v891_v30 = vadd.f32 %v890_v6, %v865_v25  ;;  %v478_v31 = vsub.f32 0.0, %v476_v26  ;;  %v479_v32 = vsub.f32 0.0, %v477_v29 }
  0xdb   : > { %v938_v34 = vpop.f32.mrf.mxu3 }
  0xdc   : > { %v915_v33 = vadd.f32 %v914_v23, %v891_v30  ;;  %v480_v35 = vmul.f32 1.442695, %v478_v31  ;;  %v482_v36 = vmul.f32 1.442695, %v479_v32  ;;  %v533_v37 = vpop.permute.xlu1 %532 }
  0xdd   : > { %v563_v39 = vadd.f32 %v1801_v58, %v533_v37  ;;  %v709_v40 = vadd.f32 %v1817_v28, %v533_v37 }
  0xde   : > { %v939_v38 = vadd.f32 %v938_v34, %v915_v33  ;;  %1393 = vpow2.f32 %v480_v35  ;;  %v984_v44 = vpop.f32.mrf.mxu1 }
  0xdf   : > { %v962_v41 = vpop.f32.mrf.mxu0  ;;  %1395 = vpow2.f32 %v482_v36  ;;  %v589_v42 = vadd.f32 %v1799_v57, %v563_v39  ;;  %v735_v43 = vadd.f32 %v734_v51, %v709_v40  ;;  %v1010_v45 = vpop.f32.mrf.mxu2 }
  0xe0   : > { %v963_v46 = vadd.f32 %v962_v41, %v939_v38  ;;  %v1011_v47 = vadd.f32 %v1010_v45, %v836_v20 }
  0xe1   : > { %v613_v48 = vadd.f32 %v1803_v59, %v589_v42  ;;  %v759_v49 = vadd.f32 %v758_v61, %v735_v43 }
  0xe2   : > { %v985_v55 = vadd.f32 %v984_v44, %v963_v46 }
  0xe3   : > { %v637_v52 = vadd.f32 %v1811_v13, %v613_v48  ;;  %v783_v53 = vadd.f32 %v782_v62, %v759_v49  ;;  %v1036_v54 = vpop.f32.mrf.mxu3 }
  0xe4   : > { %v1394_v58 = vpop.eup %1393  ;;  %v1037_v28 = vadd.f32 %v1036_v54, %v1011_v47 }
  0xe5   : > { %v1396_v56 = vpop.eup %1395  ;;  %v484_v60 = vadd.f32 -28.0, %v1394_v58  ;;  %v661_v63 = vadd.f32 %v1815_v27, %v637_v52  ;;  %v807_v57 = vadd.f32 %v806_v1, %v783_v53 }
  0xe6   : > { %v485_v51 = vadd.f32 -28.0, %v1396_v56  ;;  %v1084_v59 = vpop.f32.mrf.mxu1 }
  0xe7   : > { %v1060_v4 = vpop.f32.mrf.mxu0  ;;  %v486_v8 = vrot.slane %v484_v60, 4  ;;  %v683_v0 = vadd.f32 %v1813_v24, %v661_v63  ;;  %v829_v2 = vadd.f32 %v828_v15, %v807_v57  ;;  %v1149_v3 = vmul.f32 %v985_v55, %v484_v60  ;;  %v1108_v7 = vpop.f32.mrf.mxu2 }
  0xe8   : > { %v492_v61 = vrot.slane %v485_v51, 4  ;;  %v1061_v13 = vadd.f32 %v1060_v4, %v1037_v28 }
  0xe9   : > { %v487_v62 = vadd.f32 %v486_v8, %v484_v60  ;;  %v1133_v5 = vmul.f32 %v683_v0, %v484_v60  ;;  %v1134_v12 = vmul.f32 %v829_v2, %v485_v51  ;;  %v1151_v1 = vrot.slane %v1149_v3, 4 }
  0xea   : > { %v493_v9 = vadd.f32 %v492_v61, %v485_v51  ;;  %v1085_v10 = vadd.f32 %v1084_v59, %v1061_v13 }
  0xeb   : > { %v488_v11 = vrot.slane %v487_v62, 2  ;;  %v1130_v14 = vpop.f32.mrf.mxu3  ;;  %v1135_v18 = vrot.slane %v1133_v5, 4  ;;  %v1141_v20 = vrot.slane %v1134_v12, 4  ;;  %v1152_v50 = vadd.f32 %v1151_v1, %v1149_v3 }
  0xec   : > { %v494_v27 = vrot.slane %v493_v9, 2  ;;  %v1109_v16 = vadd.f32 %v1108_v7, %v1085_v10 }
  0xed   : > { %v489_v17 = vadd.f32 %v488_v11, %v487_v62  ;;  %v1136_v23 = vadd.f32 %v1135_v18, %v1133_v5  ;;  %v1142_v29 = vadd.f32 %v1141_v20, %v1134_v12  ;;  %v1153_v30 = vrot.slane %v1152_v50, 2 }
  0xee   : > { %v495_v19 = vadd.f32 %v494_v27, %v493_v9  ;;  %v1131_v24 = vadd.f32 %v1130_v14, %v1109_v16 }
  0xef   : > { %v490_v15 = vrot.slane %v489_v17, 1  ;;  %v1137_v31 = vrot.slane %v1136_v23, 2  ;;  %v1143_v33 = vrot.slane %v1142_v29, 2  ;;  %v1154_v34 = vadd.f32 %v1153_v30, %v1152_v50 }
  0xf0   : > { %v496_v21 = vrot.slane %v495_v19, 1  ;;  %v1150_v22 = vmul.f32 %v1131_v24, %v485_v51 }
  0xf1   : > { %v491_v6 = vadd.f32 %v490_v15, %v489_v17  ;;  %v1138_v37 = vadd.f32 %v1137_v31, %v1136_v23  ;;  %v1144_v41 = vadd.f32 %v1143_v33, %v1142_v29  ;;  %v1155_v44 = vrot.slane %v1154_v34, 1 }
  0xf2   : > { %v497_v25 = vadd.f32 %v496_v21, %v495_v19  ;;  %v1157_v26 = vrot.slane %v1150_v22, 4 }
  0xf3   : > { %1397 = vrcp.f32 %v491_v6  ;;  %v507_v45 = vand.u32 2147483647, %v491_v6  ;;  %v509_v46 = vand.u32 2147483648, %v491_v6  ;;  %v1139_v47 = vrot.slane %v1138_v37, 1 }
  0xf4   : > { %1399 = vrcp.f32 %v497_v25  ;;  %v1158_v32 = vadd.f32 %v1157_v26, %v1150_v22  ;;  %v522_v52 = vand.u32 2147483647, %v497_v25  ;;  %v524_v53 = vand.u32 2147483648, %v497_v25 }
  0xf5   : > { %v1145_v58 = vrot.slane %v1144_v41, 1  ;;  %vm503_vm3 = vweird.f32 %v491_v6  ;;  %v1156_v56 = vadd.f32 %v1155_v44, %v1154_v34  ;;  %vm508_vm5 = vcmp.eq.f32.partialorder %v507_v45, 8.507059e+37 }
  0xf6   : > { %v1159_v35 = vrot.slane %v1158_v32, 2  ;;  %v510_v60 = vor.u32 1.1754944e-38, %v509_v46  ;;  %vm518_vm6 = vweird.f32 %v497_v25  ;;  %v1140_v51 = vadd.f32 %v1139_v47, %v1138_v37 }
  0xf7   : > { %vm523_vm8 = vcmp.eq.f32.partialorder %v522_v52, 8.507059e+37  ;;  %v525_v4 = vor.u32 1.1754944e-38, %v524_v53  ;;  %v1146_v2 = vadd.f32 %v1145_v58, %v1144_v41 }
  0xf8   : > { %v1160_v42 = vadd.f32 %v1159_v35, %v1158_v32 }
  0xf9   : > { %v1398_v36 = vpop.eup %1397 }
  0xfa   : > { %v1400_v38 = vpop.eup %1399  ;;  %v499_v39 = vmul.f32 %v1398_v36, %v491_v6  ;;  %vm504_vm1 = vweird.f32 %v1398_v36  ;;  %v1161_v55 = vrot.slane %v1160_v42, 1 }
  0xfb   : > { %v514_v40 = vmul.f32 %v1400_v38, %v497_v25  ;;  %vm519_vm2 = vweird.f32 %v1400_v38  ;;  %vm505_vm4 = vmor %vm503_vm3, %vm504_vm1 }
  0xfc   : > { %v500_v43 = vsub.f32 1.0, %v499_v39  ;;  %vm520_vm7 = vmor %vm518_vm6, %vm519_vm2  ;;  %v1162_v59 = vadd.f32 %v1161_v55, %v1160_v42 }
  0xfd   : > { %v515_v48 = vsub.f32 1.0, %v514_v40 }
  0xfe   : > { %v501_v49 = vmul.f32 %v1398_v36, %v500_v43 }
  0xff   : > { %v516_v54 = vmul.f32 %v1400_v38, %v515_v48 }
 0x100   : > { %v502_v28 = vadd.f32 %v1398_v36, %v501_v49 }
 0x101   : > { %v517_v63 = vadd.f32 %v1400_v38, %v516_v54 }
 0x102   : > { %v506_v57 = vsel %vm505_vm4, %v1398_v36, %v502_v28 }
 0x103   : > { %v511_v8 = vsel %vm508_vm5, %v510_v60, %v506_v57  ;;  %v521_v0 = vsel %vm520_vm7, %v1400_v38, %v517_v63 }
 0x104   : > { %v526_v61 = vsel %vm523_vm8, %v525_v4, %v521_v0  ;;  %v1147_v3 = vmul.f32 %v1140_v51, %v511_v8  ;;  %v1163_v13 = vmul.f32 %v1156_v56, %v511_v8 }
 0x105   : > { %v1148_v62 = vmul.f32 %v1146_v2, %v526_v61  ;;  %v1164_v5 = vmul.f32 %v1162_v59, %v526_v61 }
 0x106   : > { %v1166_v10 = vsel %vm1165_vm9, %v1147_v3, %v1163_v13 }
 0x107   : > { %v1167_v7 = vsel %vm1165_vm9, %v1148_v62, %v1164_v5 }
 0x108   : > { %v1170_v9 = vrot.slane %v1167_v7, 6 }
 0x10a   : > { %v1172_v11 = vsel %vm1171_vm10, %v1166_v10, %v1170_v9 }
 0x10b   : > { %1174 = vst [vmem:[%s325_s28] sm:$0xf] %v1172_v11 }
 0x10c   : > { %1518 = shalt.err (!%p1515_p10)
}
 0x10d   : > { %1311 = dma.vmem_to_hbm [thread:$0]  (%p1678_p0), %s1190_s10, 64, %s1192_s3, %s1176_s12  }
 0x10e PF: > { %p1333_p11 = scmp.ge.s32.totalorder %s1561_s27, 2  ;;  %s1203_s9 = sand.u32 1, %s1549_s24  }
 0x10f   : > { %s1204_s14 = scalar_lea.sflag [#allocation4], %s1203_s9 }
 0x110   : > { %p1325_p12 = pnand %p1333_p11, %p1648_p6 }
 0x112   : > { %p1326_p13 = pneg %p1325_p12 }
 0x114   : > { %1544 = dma.done.wait (%p1326_p13), %s1204_s14, 64  }
 0x115   : > { %1546 = vsyncadd (%p1326_p13), %s1204_s14, 4294967232  ;;  %p21_p3 = scmp.ge.s32.totalorder %s1668_s20, 6   ;;  %s1881_s24 = smov %s1553_s25 }
 0x116   : > { %s1882_s25 = smov %s1557_s26  ;;  %s1883_s26 = smov %s1684_s29 }
 0x117   : > { %s1884_s27 = smov %s1668_s20  ;;  %23 = sbr.rel (!%p21_p3) target bundleno = 8 (0x8), region = 101 }
 0x11c   :  { %1210 = vsyncpa [#allocation3], 1 }
 0x11d   :  { %1212 = vsyncpa [#allocation3 + $0x1], 1 }
 0x11e   :  { %1213 = vsyncpa [#allocation6], 1 }
 0x11f   :  { %1214 = vsyncpa [#allocation4], 1 }
 0x120   :  { %1216 = vsyncpa [#allocation4 + $0x1], 1 }

</bundles_post_ra>
